<compile_context>
chip_gen: v6e
topology: v6e:2x2x1
jax: 0.10.0
libtpu: 0.0.40
codegen_flags: <defaults>
</compile_context>

<pallas_src>
import functools

import jax
import jax.numpy as jnp
import numpy as np
from jax.experimental import pallas as pl
from jax.experimental.pallas import tpu as pltpu

_LANE = 128


def _round_up(v, m):
    return ((v + m - 1) // m) * m


def _pad_axis(a, axis, target):
    pad = target - a.shape[axis]
    if pad == 0:
        return a
    widths = [(0, 0)] * a.ndim
    widths[axis] = (0, pad)
    return jnp.pad(a, widths)


def _rgin_kernel(adj_ref, xs_ref, xd_ref, w1_ref, b1_ref, w2_ref, b2_ref,
                 ws_ref, bs_ref, out_ref, acc_ref, agg_ref, *, eps):
    """One grid step = (node-row tile i, relation r, src tile k)."""
    r = pl.program_id(1)
    k = pl.program_id(2)
    nr = pl.num_programs(1)
    nk = pl.num_programs(2)

    # Self-loop linear: initialise the output accumulator once per node tile.
    @pl.when(jnp.logical_and(r == 0, k == 0))
    def _():
        acc_ref[...] = (
            jnp.dot(xd_ref[...], ws_ref[...], preferred_element_type=jnp.float32)
            + bs_ref[...]
        )

    # Reset the per-relation aggregation at the start of each src sweep.
    @pl.when(k == 0)
    def _():
        agg_ref[...] = jnp.zeros_like(agg_ref)

    # Sum aggregation chunk: agg[dst] += A[r, dst, src_tile] @ x[src_tile].
    # bf16 x bf16 -> f32 accumulation on the MXU (dominant work).
    agg_ref[...] += jnp.dot(adj_ref[...], xs_ref[...],
                            preferred_element_type=jnp.float32)

    # After the last src tile: GIN update + base_net_r, accumulate into output.
    @pl.when(k == nk - 1)
    def _():
        h = (1.0 + eps) * xd_ref[...].astype(jnp.float32) + agg_ref[...]
        h1 = jnp.maximum(
            jnp.dot(h.astype(jnp.bfloat16), w1_ref[r],
                    preferred_element_type=jnp.float32) + b1_ref[r],
            0.0)
        h2 = (jnp.dot(h1.astype(jnp.bfloat16), w2_ref[r],
                      preferred_element_type=jnp.float32) + b2_ref[r])
        acc_ref[...] += h2

    # Single lane-dense store of this node tile after the last (r, k) step.
    @pl.when(jnp.logical_and(r == nr - 1, k == nk - 1))
    def _():
        out_ref[...] = acc_ref[...].astype(out_ref.dtype)


def _vmem_bytes(tm, tk, d_in_p, d_out_p, num_rel):
    """VMEM working-set estimate matching the BlockSpecs / scratch below."""
    adj = 2 * tm * tk * 2                                   # bf16 adj tile, double-buffered
    x_src = 2 * tk * d_in_p * 2                             # bf16 src x tile, db
    x_dst = 2 * tm * d_in_p * 2                             # bf16 dst x tile, db
    w_rel = 2 * num_rel * (d_in_p * d_out_p + d_out_p * d_out_p) * 2   # resident W1/W2 (bf16, db)
    b_rel = 2 * num_rel * 2 * d_out_p * 4                   # resident b1/b2 (f32, db)
    w_self = 2 * (d_in_p * d_out_p * 2 + d_out_p * 4)       # Ws (bf16) + bs (f32), db
    out = 2 * tm * d_out_p * 4                              # f32 output tile, db
    scratch = tm * (d_out_p + d_in_p) * 4                   # acc + agg f32 scratch
    return adj + x_src + x_dst + w_rel + b_rel + w_self + out + scratch


def _pick_tiles(n_pad, d_in_p, d_out_p, num_rel, budget_bytes):
    """Largest (TM, TK) that keeps the VMEM working set under budget."""
    tk = min(n_pad, 512)
    while n_pad % tk != 0:
        tk //= 2
    for tm in (1024, 512, 256, 128, 64):
        if tm > n_pad or n_pad % tm != 0:
            continue
        if _vmem_bytes(tm, tk, d_in_p, d_out_p, num_rel) <= budget_bytes:
            return tm, tk
    return 64, tk


def rgin_conv(x, adj, w1, b1, w2, b2, ws, bs, *, eps):
    """x: (N, D_in), adj: (R, N, N) with adj[r, dst, src] = edge count,
    w1: (R, D_in, D_out), b1: (R, 1, D_out), w2: (R, D_out, D_out),
    b2: (R, 1, D_out), ws: (D_in, D_out), bs: (1, D_out)."""
    N, D_in = x.shape
    R = adj.shape[0]
    D_out = ws.shape[1]

    d_in_p = _round_up(D_in, _LANE)
    d_out_p = _round_up(D_out, _LANE)
    n_pad = _round_up(N, _LANE)

    # Generation-aware VMEM sizing (v5e/v6e: 128 MiB, v7x: 64 MiB).
    try:
        vmem_cap = int(pltpu.get_tpu_info().vmem_capacity_bytes)
    except Exception:
        vmem_cap = 64 * 1024 * 1024
    budget = int(vmem_cap * 0.70)

    tm, tk = _pick_tiles(n_pad, d_in_p, d_out_p, R, budget)
    # Megacore: make sure the "parallel" node axis has at least 2 tiles so
    # both v7x TensorCores get work (harmless on single-TC chips).
    while n_pad // tm < 2 and tm >= 128:
        tm //= 2
    n_tiles = n_pad // tm
    k_tiles = n_pad // tk

    vmem_usage = _vmem_bytes(tm, tk, d_in_p, d_out_p, R)
    vmem_limit = min(int(vmem_cap * 0.90),
                     max(vmem_usage + 8 * 1024 * 1024, 32 * 1024 * 1024))

    # Zero-padding is semantics-preserving: padded src rows / feature columns
    # contribute nothing, padded dst rows / output columns are sliced off below.
    # bf16 cast: adjacency entries are small integer edge counts (exact in
    # bf16); x / weights round to bf16, accumulation stays f32 on the MXU.
    x_p = _pad_axis(_pad_axis(x, 0, n_pad), 1, d_in_p).astype(jnp.bfloat16)
    adj_p = _pad_axis(_pad_axis(adj, 1, n_pad), 2, n_pad).astype(jnp.bfloat16)
    w1_p = _pad_axis(_pad_axis(w1, 1, d_in_p), 2, d_out_p).astype(jnp.bfloat16)
    b1_p = _pad_axis(b1, 2, d_out_p).astype(jnp.float32)
    w2_p = _pad_axis(_pad_axis(w2, 1, d_out_p), 2, d_out_p).astype(jnp.bfloat16)
    b2_p = _pad_axis(b2, 2, d_out_p).astype(jnp.float32)
    ws_p = _pad_axis(_pad_axis(ws, 0, d_in_p), 1, d_out_p).astype(jnp.bfloat16)
    bs_p = _pad_axis(bs, 1, d_out_p).astype(jnp.float32)

    kernel = functools.partial(_rgin_kernel, eps=float(eps))

    out_p = pl.pallas_call(
        kernel,
        out_shape=jax.ShapeDtypeStruct((n_pad, d_out_p), jnp.float32),
        grid_spec=pltpu.PrefetchScalarGridSpec(
            num_scalar_prefetch=0,
            grid=(n_tiles, R, k_tiles),
            in_specs=[
                # adj[r], dst-row tile i, src tile k.
                pl.BlockSpec((pl.Squeezed(), tm, tk), lambda i, r, k: (r, i, k)),
                # x src tile (K-tiled side of the aggregation matmul).
                pl.BlockSpec((tk, d_in_p), lambda i, r, k: (k, 0)),
                # x dst-row tile (self-loop + (1+eps)*x term).
                pl.BlockSpec((tm, d_in_p), lambda i, r, k: (i, 0)),
                # Relation weights: full, index-invariant -> VMEM-resident.
                pl.BlockSpec((R, d_in_p, d_out_p), lambda i, r, k: (0, 0, 0)),   # W1
                pl.BlockSpec((R, 1, d_out_p), lambda i, r, k: (0, 0, 0)),        # b1
                pl.BlockSpec((R, d_out_p, d_out_p), lambda i, r, k: (0, 0, 0)),  # W2
                pl.BlockSpec((R, 1, d_out_p), lambda i, r, k: (0, 0, 0)),        # b2
                pl.BlockSpec((d_in_p, d_out_p), lambda i, r, k: (0, 0)),         # Ws
                pl.BlockSpec((1, d_out_p), lambda i, r, k: (0, 0)),              # bs
            ],
            out_specs=pl.BlockSpec((tm, d_out_p), lambda i, r, k: (i, 0)),
            scratch_shapes=[
                pltpu.VMEM((tm, d_out_p), jnp.float32),   # output accumulator
                pltpu.VMEM((tm, d_in_p), jnp.float32),    # per-relation aggregation
            ],
        ),
        compiler_params=pltpu.CompilerParams(
            dimension_semantics=("parallel", "arbitrary", "arbitrary"),
            vmem_limit_bytes=vmem_limit,
        ),
    )(adj_p, x_p, x_p, w1_p, b1_p, w2_p, b2_p, ws_p, bs_p)

    return out_p[:N, :D_out]


def reference(x, edge_index, edge_type, w1, b1, w2, b2, ws, bs, *, eps, num_relations):
    """Plain-JAX reference mirroring the kernel's bf16 rounding points so the
    correctness check can stay tight while the kernel runs the bf16 MXU path."""
    rnd = lambda a: a.astype(jnp.bfloat16).astype(jnp.float32)
    x_r, w1_r, w2_r, ws_r = rnd(x), rnd(w1), rnd(w2), rnd(ws)
    out = x_r @ ws_r + bs
    N = x.shape[0]
    src, dst = edge_index[0], edge_index[1]
    for r in range(num_relations):
        mask = (edge_type == r).astype(x.dtype)                       # (E,)
        msgs = x_r[src] * mask[:, None]                               # zero out other relations
        agg = jnp.zeros((N, x.shape[1]), jnp.float32).at[dst].add(msgs)
        h = rnd((1.0 + eps) * x_r + agg)
        h1 = rnd(jnp.maximum(h @ w1_r[r] + b1[r, 0], 0.0))
        out = out + h1 @ w2_r[r] + b2[r, 0]
    return out


if __name__ == "__main__":
    key = jax.random.PRNGKey(0)

    # Small shapes consistent with the module's forward.
    N, D_in, D_out, R, E = 16, 16, 32, 3, 40
    eps = 0.1

    k = jax.random.split(key, 10)
    x = jax.random.normal(k[0], (N, D_in), jnp.float32)
    src = jax.random.randint(k[1], (E,), 0, N)
    dst = jax.random.randint(k[2], (E,), 0, N)
    edge_index = jnp.stack([src, dst], axis=0)                        # (2, E)
    edge_type = jax.random.randint(k[3], (E,), 0, R)                  # (E,)

    # Deterministic parameter init (synthetic; shapes match the module's __init__).
    scale_in = 1.0 / np.sqrt(D_in)
    scale_out = 1.0 / np.sqrt(D_out)
    ws = jax.random.uniform(k[4], (D_in, D_out), jnp.float32, -scale_in, scale_in)
    bs = jax.random.uniform(k[5], (1, D_out), jnp.float32, -scale_in, scale_in)
    w1 = jax.random.uniform(k[6], (R, D_in, D_out), jnp.float32, -scale_in, scale_in)
    b1 = jax.random.uniform(k[7], (R, 1, D_out), jnp.float32, -scale_in, scale_in)
    w2 = jax.random.uniform(k[8], (R, D_out, D_out), jnp.float32, -scale_out, scale_out)
    b2 = jax.random.uniform(k[9], (R, 1, D_out), jnp.float32, -scale_out, scale_out)

    # Dense per-relation adjacency: A[r, dst, src] = #edges (glue; not the hot path).
    adj = jnp.zeros((R, N, N), jnp.float32).at[edge_type, dst, src].add(1.0)

    out = rgin_conv(x, adj, w1, b1, w2, b2, ws, bs, eps=eps)
    out = jax.block_until_ready(out)

    ref = reference(x, edge_index, edge_type, w1, b1, w2, b2, ws, bs,
                    eps=eps, num_relations=R)
    np.testing.assert_allclose(np.asarray(out), np.asarray(ref), rtol=5e-3, atol=5e-3)

    print("KERNEL_OK")
</pallas_src>

<mosaic_0001>
module attributes {stable_mosaic.version = 11 : i64} {
  func.func @_rgin_kernel(%arg0: i32, %arg1: i32, %arg2: i32, %arg3: memref<1x64x128xbf16, #tpu.memory_space<vmem>>, %arg4: memref<128x128xbf16, #tpu.memory_space<vmem>>, %arg5: memref<64x128xbf16, #tpu.memory_space<vmem>>, %arg6: memref<3x128x128xbf16, #tpu.memory_space<vmem>>, %arg7: memref<3x1x128xf32, #tpu.memory_space<vmem>>, %arg8: memref<3x128x128xbf16, #tpu.memory_space<vmem>>, %arg9: memref<3x1x128xf32, #tpu.memory_space<vmem>>, %arg10: memref<128x128xbf16, #tpu.memory_space<vmem>>, %arg11: memref<1x128xf32, #tpu.memory_space<vmem>>, %arg12: memref<64x128xf32, #tpu.memory_space<vmem>>, %arg13: memref<64x128xf32, #tpu.memory_space<vmem>>, %arg14: memref<64x128xf32, #tpu.memory_space<vmem>>) attributes {dimension_semantics = [#tpu.dimension_semantics<parallel>, #tpu.dimension_semantics<arbitrary>, #tpu.dimension_semantics<arbitrary>], iteration_bounds = array<i64: 2, 3, 1>, scalar_prefetch = 0 : i64, scratch_operands = 2 : i64, tpu.core_type = #tpu.core_type<tc>, window_params = [{transform_indices = @transform_0, window_bounds = array<i64: 1, 64, 128>}, {transform_indices = @transform_1, window_bounds = array<i64: 128, 128>}, {transform_indices = @transform_2, window_bounds = array<i64: 64, 128>}, {pipeline_mode = #tpu.pipeline_mode<synchronous>, transform_indices = @transform_3, window_bounds = array<i64: 3, 128, 128>}, {pipeline_mode = #tpu.pipeline_mode<synchronous>, transform_indices = @transform_4, window_bounds = array<i64: 3, 1, 128>}, {pipeline_mode = #tpu.pipeline_mode<synchronous>, transform_indices = @transform_5, window_bounds = array<i64: 3, 128, 128>}, {pipeline_mode = #tpu.pipeline_mode<synchronous>, transform_indices = @transform_6, window_bounds = array<i64: 3, 1, 128>}, {pipeline_mode = #tpu.pipeline_mode<synchronous>, transform_indices = @transform_7, window_bounds = array<i64: 128, 128>}, {pipeline_mode = #tpu.pipeline_mode<synchronous>, transform_indices = @transform_8, window_bounds = array<i64: 1, 128>}, {transform_indices = @transform_9, window_bounds = array<i64: 64, 128>}]} {
    %c0_i32 = arith.constant 0 : i32
    %0 = arith.cmpi eq, %arg1, %c0_i32 : i32
    %c0_i32_0 = arith.constant 0 : i32
    %1 = arith.cmpi eq, %arg2, %c0_i32_0 : i32
    %2 = arith.andi %0, %1 : i1
    %3 = arith.extui %2 : i1 to i32
    %c0_i32_1 = arith.constant 0 : i32
    %4 = arith.cmpi ne, %3, %c0_i32_1 : i32
    scf.if %4 {
      %c0_16 = arith.constant 0 : index
      %c0_17 = arith.constant 0 : index
      %23 = vector.load %arg5[%c0_16, %c0_17] : memref<64x128xbf16, #tpu.memory_space<vmem>>, vector<64x128xbf16>
      %c0_18 = arith.constant 0 : index
      %c0_19 = arith.constant 0 : index
      %24 = vector.load %arg10[%c0_18, %c0_19] : memref<128x128xbf16, #tpu.memory_space<vmem>>, vector<128x128xbf16>
      %cst_20 = arith.constant dense<0.000000e+00> : vector<64x128xf32>
      %25 = tpu.matmul %23, %24, %cst_20 {dimension_numbers = #tpu.dot_dimension_numbers<[1], [0], [0], [1], [0, 0, 1, 1], [], []>} : vector<64x128xbf16>, vector<128x128xbf16>, vector<64x128xf32> -> vector<64x128xf32>
      %c0_21 = arith.constant 0 : index
      %c0_22 = arith.constant 0 : index
      %26 = vector.load %arg11[%c0_21, %c0_22] : memref<1x128xf32, #tpu.memory_space<vmem>>, vector<1x128xf32>
      %27 = vector.broadcast %26 : vector<1x128xf32> to vector<64x128xf32>
      %28 = arith.addf %25, %27 : vector<64x128xf32>
      %c0_23 = arith.constant 0 : index
      %c0_24 = arith.constant 0 : index
      %29 = vector.load %arg13[%c0_23, %c0_24] : memref<64x128xf32, #tpu.memory_space<vmem>>, vector<64x128xf32>
      tpu.vector_store %arg13[%c0_23, %c0_24], %28 {strides = array<i32>} : memref<64x128xf32, #tpu.memory_space<vmem>>, vector<64x128xf32>,
    } else {
    }
    %c0_i32_2 = arith.constant 0 : i32
    %5 = arith.cmpi eq, %arg2, %c0_i32_2 : i32
    %6 = arith.extui %5 : i1 to i32
    %c0_i32_3 = arith.constant 0 : i32
    %7 = arith.cmpi ne, %6, %c0_i32_3 : i32
    scf.if %7 {
      %cst_16 = arith.constant 0.000000e+00 : f32
      %23 = vector.broadcast %cst_16 : f32 to vector<64x128xf32>
      %c0_17 = arith.constant 0 : index
      %c0_18 = arith.constant 0 : index
      %24 = vector.load %arg14[%c0_17, %c0_18] : memref<64x128xf32, #tpu.memory_space<vmem>>, vector<64x128xf32>
      tpu.vector_store %arg14[%c0_17, %c0_18], %23 {strides = array<i32>} : memref<64x128xf32, #tpu.memory_space<vmem>>, vector<64x128xf32>,
    } else {
    }
    %c0 = arith.constant 0 : index
    %c0_4 = arith.constant 0 : index
    %8 = vector.load %arg14[%c0, %c0_4] : memref<64x128xf32, #tpu.memory_space<vmem>>, vector<64x128xf32>
    %c0_5 = arith.constant 0 : index
    %c0_6 = arith.constant 0 : index
    %c0_7 = arith.constant 0 : index
    %9 = vector.load %arg3[%c0_5, %c0_6, %c0_7] : memref<1x64x128xbf16, #tpu.memory_space<vmem>>, vector<1x64x128xbf16>
    %10 = vector.shape_cast %9 : vector<1x64x128xbf16> to vector<64x128xbf16>
    %c0_8 = arith.constant 0 : index
    %c0_9 = arith.constant 0 : index
    %11 = vector.load %arg4[%c0_8, %c0_9] : memref<128x128xbf16, #tpu.memory_space<vmem>>, vector<128x128xbf16>
    %cst = arith.constant dense<0.000000e+00> : vector<64x128xf32>
    %12 = tpu.matmul %10, %11, %cst {dimension_numbers = #tpu.dot_dimension_numbers<[1], [0], [0], [1], [0, 0, 1, 1], [], []>} : vector<64x128xbf16>, vector<128x128xbf16>, vector<64x128xf32> -> vector<64x128xf32>
    %13 = arith.addf %8, %12 : vector<64x128xf32>
    %c0_10 = arith.constant 0 : index
    %c0_11 = arith.constant 0 : index
    %14 = vector.load %arg14[%c0_10, %c0_11] : memref<64x128xf32, #tpu.memory_space<vmem>>, vector<64x128xf32>
    tpu.vector_store %arg14[%c0_10, %c0_11], %13 {strides = array<i32>} : memref<64x128xf32, #tpu.memory_space<vmem>>, vector<64x128xf32>,
    %c0_i32_12 = arith.constant 0 : i32
    %15 = arith.cmpi eq, %arg2, %c0_i32_12 : i32
    %16 = arith.extui %15 : i1 to i32
    %c0_i32_13 = arith.constant 0 : i32
    %17 = arith.cmpi ne, %16, %c0_i32_13 : i32
    scf.if %17 {
      %c0_16 = arith.constant 0 : index
      %c0_17 = arith.constant 0 : index
      %23 = vector.load %arg5[%c0_16, %c0_17] : memref<64x128xbf16, #tpu.memory_space<vmem>>, vector<64x128xbf16>
      %24 = arith.extf %23 : vector<64x128xbf16> to vector<64x128xf32>
      %cst_18 = arith.constant 1.100000e+00 : f32
      %25 = vector.broadcast %cst_18 : f32 to vector<64x128xf32>
      %26 = arith.mulf %25, %24 : vector<64x128xf32>
      %c0_19 = arith.constant 0 : index
      %c0_20 = arith.constant 0 : index
      %27 = vector.load %arg14[%c0_19, %c0_20] : memref<64x128xf32, #tpu.memory_space<vmem>>, vector<64x128xf32>
      %28 = arith.addf %26, %27 : vector<64x128xf32>
      %29 = arith.truncf %28 : vector<64x128xf32> to vector<64x128xbf16>
      %30 = arith.index_cast %arg1 : i32 to index
      %c0_21 = arith.constant 0 : index
      %c0_22 = arith.constant 0 : index
      %31 = vector.load %arg6[%30, %c0_21, %c0_22] : memref<3x128x128xbf16, #tpu.memory_space<vmem>>, vector<1x128x128xbf16>
      %32 = vector.shape_cast %31 : vector<1x128x128xbf16> to vector<128x128xbf16>
      %cst_23 = arith.constant dense<0.000000e+00> : vector<64x128xf32>
      %33 = tpu.matmul %29, %32, %cst_23 {dimension_numbers = #tpu.dot_dimension_numbers<[1], [0], [0], [1], [0, 0, 1, 1], [], []>} : vector<64x128xbf16>, vector<128x128xbf16>, vector<64x128xf32> -> vector<64x128xf32>
      %34 = arith.index_cast %arg1 : i32 to index
      %c0_24 = arith.constant 0 : index
      %c0_25 = arith.constant 0 : index
      %35 = vector.load %arg7[%34, %c0_24, %c0_25] : memref<3x1x128xf32, #tpu.memory_space<vmem>>, vector<1x1x128xf32>
      %36 = vector.shape_cast %35 : vector<1x1x128xf32> to vector<1x128xf32>
      %37 = vector.broadcast %36 : vector<1x128xf32> to vector<64x128xf32>
      %38 = arith.addf %33, %37 : vector<64x128xf32>
      %cst_26 = arith.constant 0.000000e+00 : f32
      %39 = vector.broadcast %cst_26 : f32 to vector<64x128xf32>
      %40 = arith.maximumf %38, %39 : vector<64x128xf32>
      %41 = arith.truncf %40 : vector<64x128xf32> to vector<64x128xbf16>
      %42 = arith.index_cast %arg1 : i32 to index
      %c0_27 = arith.constant 0 : index
      %c0_28 = arith.constant 0 : index
      %43 = vector.load %arg8[%42, %c0_27, %c0_28] : memref<3x128x128xbf16, #tpu.memory_space<vmem>>, vector<1x128x128xbf16>
      %44 = vector.shape_cast %43 : vector<1x128x128xbf16> to vector<128x128xbf16>
      %cst_29 = arith.constant dense<0.000000e+00> : vector<64x128xf32>
      %45 = tpu.matmul %41, %44, %cst_29 {dimension_numbers = #tpu.dot_dimension_numbers<[1], [0], [0], [1], [0, 0, 1, 1], [], []>} : vector<64x128xbf16>, vector<128x128xbf16>, vector<64x128xf32> -> vector<64x128xf32>
      %46 = arith.index_cast %arg1 : i32 to index
      %c0_30 = arith.constant 0 : index
      %c0_31 = arith.constant 0 : index
      %47 = vector.load %arg9[%46, %c0_30, %c0_31] : memref<3x1x128xf32, #tpu.memory_space<vmem>>, vector<1x1x128xf32>
      %48 = vector.shape_cast %47 : vector<1x1x128xf32> to vector<1x128xf32>
      %49 = vector.broadcast %48 : vector<1x128xf32> to vector<64x128xf32>
      %50 = arith.addf %45, %49 : vector<64x128xf32>
      %c0_32 = arith.constant 0 : index
      %c0_33 = arith.constant 0 : index
      %51 = vector.load %arg13[%c0_32, %c0_33] : memref<64x128xf32, #tpu.memory_space<vmem>>, vector<64x128xf32>
      %52 = arith.addf %51, %50 : vector<64x128xf32>
      %c0_34 = arith.constant 0 : index
      %c0_35 = arith.constant 0 : index
      %53 = vector.load %arg13[%c0_34, %c0_35] : memref<64x128xf32, #tpu.memory_space<vmem>>, vector<64x128xf32>
      tpu.vector_store %arg13[%c0_34, %c0_35], %52 {strides = array<i32>} : memref<64x128xf32, #tpu.memory_space<vmem>>, vector<64x128xf32>,
    } else {
    }
    %c2_i32 = arith.constant 2 : i32
    %18 = arith.cmpi eq, %arg1, %c2_i32 : i32
    %c0_i32_14 = arith.constant 0 : i32
    %19 = arith.cmpi eq, %arg2, %c0_i32_14 : i32
    %20 = arith.andi %18, %19 : i1
    %21 = arith.extui %20 : i1 to i32
    %c0_i32_15 = arith.constant 0 : i32
    %22 = arith.cmpi ne, %21, %c0_i32_15 : i32
    scf.if %22 {
      %c0_16 = arith.constant 0 : index
      %c0_17 = arith.constant 0 : index
      %23 = vector.load %arg13[%c0_16, %c0_17] : memref<64x128xf32, #tpu.memory_space<vmem>>, vector<64x128xf32>
      %c0_18 = arith.constant 0 : index
      %c0_19 = arith.constant 0 : index
      %24 = vector.load %arg12[%c0_18, %c0_19] : memref<64x128xf32, #tpu.memory_space<vmem>>, vector<64x128xf32>
      tpu.vector_store %arg12[%c0_18, %c0_19], %23 {strides = array<i32>} : memref<64x128xf32, #tpu.memory_space<vmem>>, vector<64x128xf32>,
    } else {
    }
    return
  }
  func.func @transform_0(%arg0: i32, %arg1: i32, %arg2: i32) -> (i32, i32, i32) {
    %c0_i32 = arith.constant 0 : i32
    return %arg1, %arg0, %arg2 : i32, i32, i32
  }
  func.func @transform_1(%arg0: i32, %arg1: i32, %arg2: i32) -> (i32, i32) {
    %c0_i32 = arith.constant 0 : i32
    %c0_i32_0 = arith.constant 0 : i32
    return %arg2, %c0_i32 : i32, i32
  }
  func.func @transform_2(%arg0: i32, %arg1: i32, %arg2: i32) -> (i32, i32) {
    %c0_i32 = arith.constant 0 : i32
    %c0_i32_0 = arith.constant 0 : i32
    return %arg0, %c0_i32 : i32, i32
  }
  func.func @transform_3(%arg0: i32, %arg1: i32, %arg2: i32) -> (i32, i32, i32) {
    %c0_i32 = arith.constant 0 : i32
    %c0_i32_0 = arith.constant 0 : i32
    %c0_i32_1 = arith.constant 0 : i32
    %c0_i32_2 = arith.constant 0 : i32
    return %c0_i32, %c0_i32_0, %c0_i32_1 : i32, i32, i32
  }
  func.func @transform_4(%arg0: i32, %arg1: i32, %arg2: i32) -> (i32, i32, i32) {
    %c0_i32 = arith.constant 0 : i32
    %c0_i32_0 = arith.constant 0 : i32
    %c0_i32_1 = arith.constant 0 : i32
    %c0_i32_2 = arith.constant 0 : i32
    return %c0_i32, %c0_i32_0, %c0_i32_1 : i32, i32, i32
  }
  func.func @transform_5(%arg0: i32, %arg1: i32, %arg2: i32) -> (i32, i32, i32) {
    %c0_i32 = arith.constant 0 : i32
    %c0_i32_0 = arith.constant 0 : i32
    %c0_i32_1 = arith.constant 0 : i32
    %c0_i32_2 = arith.constant 0 : i32
    return %c0_i32, %c0_i32_0, %c0_i32_1 : i32, i32, i32
  }
  func.func @transform_6(%arg0: i32, %arg1: i32, %arg2: i32) -> (i32, i32, i32) {
    %c0_i32 = arith.constant 0 : i32
    %c0_i32_0 = arith.constant 0 : i32
    %c0_i32_1 = arith.constant 0 : i32
    %c0_i32_2 = arith.constant 0 : i32
    return %c0_i32, %c0_i32_0, %c0_i32_1 : i32, i32, i32
  }
  func.func @transform_7(%arg0: i32, %arg1: i32, %arg2: i32) -> (i32, i32) {
    %c0_i32 = arith.constant 0 : i32
    %c0_i32_0 = arith.constant 0 : i32
    %c0_i32_1 = arith.constant 0 : i32
    return %c0_i32, %c0_i32_0 : i32, i32
  }
  func.func @transform_8(%arg0: i32, %arg1: i32, %arg2: i32) -> (i32, i32) {
    %c0_i32 = arith.constant 0 : i32
    %c0_i32_0 = arith.constant 0 : i32
    %c0_i32_1 = arith.constant 0 : i32
    return %c0_i32, %c0_i32_0 : i32, i32
  }
  func.func @transform_9(%arg0: i32, %arg1: i32, %arg2: i32) -> (i32, i32) {
    %c0_i32 = arith.constant 0 : i32
    %c0_i32_0 = arith.constant 0 : i32
    return %arg0, %c0_i32 : i32, i32
  }
}

</mosaic_0001>

<bundles_post_ra>
// kernel: tpu_custom_call.1
= control target key start
LH: loop header
LB: loop body
LE: loop exit
PB: predicated region body
PF: predicated region fallthrough
CT: control target
= control target key end

     0   :  { %s2635_s0 = inlined_call_operand.hbm [shape: bf16[3,128,128], index: 0, kind: input, shape index: {}]   ;;  %s2636_s1 = inlined_call_operand.hbm [shape: bf16[128,128], index: 1, kind: input, shape index: {}]   ;;  %s2637_s2 = inlined_call_operand.hbm [shape: bf16[128,128], index: 2, kind: input, shape index: {}]   ;;  %s2638_s3 = inlined_call_operand.hbm [shape: bf16[3,128,128], index: 3, kind: input, shape index: {}]   ;;  %s2639_s4 = inlined_call_operand.vmem [shape: f32[3,1,128], index: 4, kind: input, shape index: {}]   ;;  %s2640_s5 = inlined_call_operand.hbm [shape: bf16[3,128,128], index: 5, kind: input, shape index: {}]   ;;  %s2641_s6 = inlined_call_operand.vmem [shape: f32[3,1,128], index: 6, kind: input, shape index: {}]   ;;  %s2642_s7 = inlined_call_operand.hbm [shape: bf16[128,128], index: 7, kind: input, shape index: {}]   ;;  %s2643_s8 = inlined_call_operand.vmem [shape: f32[1,128], index: 8, kind: input, shape index: {}]   ;;  %s2644_s9 = inlined_call_operand.hbm [shape: f32[128,128], index: 9, kind: output, shape index: {}]  }
   0x1   :  { %2665 = sst [smem:[#allocation30_spill]] %s2636_s1 }
   0x2   :  { %2666 = sst [smem:[#allocation31_spill]] %s2639_s4 }
   0x3   :  { %2667 = sst [smem:[#allocation32_spill]] %s2640_s5 }
   0x4   :  { %2668 = sst [smem:[#allocation33_spill]] %s2641_s6 }
   0x5   :  { %2669 = sst [smem:[#allocation34_spill]] %s2643_s8 }
   0x6   :  { %2670 = sst [smem:[#allocation35_spill]] %s2644_s9 }
   0x7   :  { %14 = vsyncpa [#allocation5], 0 }
   0x8   :  { %16 = vsyncpa [#allocation5 + $0x1], 0 }
   0x9   :  { %17 = vsyncpa [#allocation8], 0 }
   0xa   :  { %18 = vsyncpa [#allocation12], 0 }
   0xb   :  { %19 = vsyncpa [#allocation6], 0 }
   0xc   :  { %21 = vsyncpa [#allocation6 + $0x1], 0  ;;  %s2245_s30 = smov 0   ;;  %s2247_s10 = smov 0  }
   0xd   :  { %s2249_s11 = smov 0   ;;  %s2251_s12 = smov 0  }
   0xe   :  { %s2253_s13 = smov 0   ;;  %s2255_s14 = smov 0  }
   0xf   :  { %s2257_s15 = smov 0   ;;  %s2259_s16 = smov 0  }
  0x10   :  { %s2261_s17 = smov 0   ;;  %s2263_s18 = smov 0  }
  0x11   :  { %s2265_s19 = smov 0  }
  0x12 LB: > { %2671 = sst [smem:[#allocation21_spill]] %s2142_s30  ;;  %s2301_s20 = sadd.s32 4294967295, %s2182_s19   ;;  %s2182_s19 = sphi %s2265_s19, %s27_s19   ;;  %s2178_s18 = sphi %s2263_s18, %s2731_s18   ;;  %s2174_s17 = sphi %s2261_s17, %s2730_s17   ;;  %s2170_s16 = sphi %s2259_s16, %s2729_s16   ;;  %s2166_s15 = sphi %s2257_s15, %s2728_s15   ;;  %s2162_s14 = sphi %s2255_s14, %s2727_s14   ;;  %s2158_s13 = sphi %s2253_s13, %s2726_s13   ;;  %s2154_s12 = sphi %s2251_s12, %s2725_s12   ;;  %s2150_s11 = sphi %s2249_s11, %s2724_s11   ;;  %s2146_s10 = sphi %s2247_s10, %s2723_s10   ;;  %s2142_s30 = sphi %s2245_s30, %s2722_s30  }
  0x13   : > { %2672 = sst [smem:[#allocation22_spill]] %s2166_s15  ;;  %s1418_s21 = sadd.s32 4294967294, %s2182_s19  }
  0x14   : > { %2673 = sst [smem:[#allocation23_spill]] %s2170_s16  ;;  %p2659_p0 = scmp.eq.s32.totalorder %s2301_s20, 0 }
  0x15   : > { %p122_p1 = scmp.ne.s32.totalorder %s2146_s10, %s2142_s30  ;;  %p278_p3 = scmp.eq.s32.totalorder %s1418_s21, 5 }
  0x16   : > { %p1419_p5 = scmp.ge.s32.totalorder %s2182_s19, 1  ;;  %p285_p7 = scmp.lt.s32.totalorder %s2182_s19, 7 }
  0x17   : > { %p2310_p4 = por %p122_p1, %p2659_p0  ;;  %p2315_p6 = por %p278_p3, %p122_p1 }
  0x18   : > { %p2320_p8 = pnand %p1419_p5, %p285_p7  ;;  %s2184_s25 = smov [#allocation7]  }
  0x19   : > { %s2674_s22 = scalar_select %p2310_p4, 1, 0 }
  0x1a   : > { %s2676_s23 = scalar_select %p2315_p6, 1, 0 }
  0x1b   : > { %2675 = sst [smem:[#allocation24_spill]] %s2674_s22  ;;  %s300_s26 = sshll.u32 %s2184_s25, 4  ;;  %s301_s26 = int_to_ptr.vmem [resolvable:$true] %s300_s26 }
  0x1c   : > { %2677 = sst [smem:[#allocation25_spill]] %s2676_s23  ;;  %p1716_p9 = pneg %p2320_p8 }
  0x1d   : > { %s2185_s28 = smov [#allocation11]   ;;  %s1897_s21 = scalar_lea.vmem %s301_s26, 1024 }
  0x1e   : > { %p2328_p10 = pnand %p1716_p9, %p2659_p0  ;;  %s329_s29 = sshll.u32 %s2185_s28, 4  ;;  %s330_s29 = int_to_ptr.vmem [resolvable:$true] %s329_s29 }
  0x1f   : > { %p1898_p12 = scmp.ne.s32.totalorder %s301_s26, %s1897_s21  ;;  %p1905_p3 = scmp.lt.s32.totalorder %s301_s26, %s301_s26 }
  0x20   : > { %p2662_p11 = pneg %p2328_p10  ;;  %p1906_p5 = scmp.lt.s32.totalorder %s1897_s21, %s1897_s21 }
  0x22   : > { %p1900_p13 = pnand %p1898_p12, %p2662_p11  ;;  %p1907_p7 = por %p1906_p5, %p1905_p3 }
  0x24   : > { %p1901_p1 = pneg %p1900_p13 }
  0x26   : > { %p1908_p9 = pnand %p1907_p7, %p1901_p1 }
  0x28   : > { %1911 = shalt.err (!%p1908_p9)
}
  0x29   : > { %s2648_s25 = smov 64   ;;  %s2650_s23 = smov 4  }
  0x2a   : > { %s2680_s1 = sld [smem:[#allocation30_spill]]  ;;  %s1923_s9 = scalar_lea.vmem %s330_s29, 3072 }
  0x2b   : > { %p1924_p12 = scmp.ne.s32.totalorder %s330_s29, %s1923_s9  ;;  %p1931_p1 = scmp.lt.s32.totalorder %s330_s29, %s330_s29 }
  0x2c   : > { %p1932_p5 = scmp.lt.s32.totalorder %s1923_s9, %s1923_s9 }
  0x2d   : > { %p1926_p13 = pnand %p1924_p12, %p2662_p11 }
  0x2e   : > { %p1933_p7 = por %p1932_p5, %p1931_p1 }
  0x2f   : > { %p1927_p3 = pneg %p1926_p13 }
  0x30   : > { %1719 = dma.hbm_to_vmem [thread:$0]  (!%p2328_p10), %s2680_s1, 1024, %s301_s26, [#allocation8], %s2648_s25, %s2648_s25, %s2650_s23  }
  0x31   : > { %p1934_p9 = pnand %p1933_p7, %p1927_p3 }
  0x33   : > { %1937 = shalt.err (!%p1934_p9)
}
  0x34   : > { %s2681_s5 = sld [smem:[#allocation32_spill]]  ;;  %s42_s9 = sadd.s32 1, %s2174_s17 }
  0x35   : > { %s46_s30 = sadd.s32 1, %s2178_s18  ;;  %p44_p12 = scmp.ge.s32.totalorder %s42_s9, 3 }
  0x36   : > { %s57_s16 = sadd.s32 1, %s2162_s14  ;;  %p64_p13 = scmp.ne.s32.totalorder %s2162_s14, %s2158_s13 }
  0x37   : > { %p2660_p3 = scmp.eq.s32.totalorder %s2182_s19, 0  ;;  %s2733_s9 = smov (%p44_p12, %s42_s9), 0 }
  0x38   : > { %2682 = sst [smem:[#allocation26_spill]] %s2733_s9  ;;  %s2735_s30 = smov (!%p44_p12, %s46_s30), %s2178_s18 }
  0x39   : > { %s50_s26 = ssub.s32 %s2174_s17, %s2733_s9  ;;  %p2369_p1 = por %p2660_p3, %p64_p13 }
  0x3a   : > { %1725 = dma.hbm_to_vmem [thread:$0]  (!%p2328_p10), %s2681_s5, 3072, %s330_s29, [#allocation12], %s2648_s25, %s2648_s25, %s2650_s23  }
  0x3b   : > { %p48_p5 = scmp.ge.s32.totalorder %s2735_s30, 2  ;;  %p70_p7 = scmp.ne.s32.totalorder %s2158_s13, %s2154_s12 }
  0x3c   : > { %p2661_p9 = scmp.lt.s32.totalorder %s2182_s19, 6  ;;  %s362_s28 = sand.u32 1, %s2182_s19  }
  0x3d   : > { %s2737_s30 = smov (%p48_p5, %s2735_s30), 0  ;;  %p2381_p2 = por %p2659_p0, %p70_p7 }
  0x3e   : > { %2684 = sst [smem:[#allocation27_spill]] %s2737_s30  ;;  %s2387_s25 = ssub.s32 %s2178_s18, %s2737_s30 }
  0x3f   : > { %s2685_s21 = scalar_select %p2381_p2, 1, 0 }
  0x40   : > { %s364_s23 = sand.u32 1, %s2162_s14   ;;  %s52_s1 = sor.u32 %s2387_s25, %s50_s26 }
  0x41   : > { %2686 = sst [smem:[#allocation28_spill]] %s2685_s21  ;;  %p55_p13 = scmp.eq.s32.totalorder %s52_s1, 0 }
  0x42   : > { %s1425_s12 = sshll.u32 %s364_s23, 5  ;;  %s1426_s5 = sshll.u32 %s2178_s18, 3 }
  0x43   : > { %s2394_s9 = scalar_select %p55_p13, %s2162_s14, %s57_s16  }
  0x44   : > { %s1427_s6 = sshll.u32 %s2174_s17, 4  ;;  %s366_s4 = scalar_lea.vmem [#allocation4], %s1425_s12 }
  0x45   : > { %2687 = sst [smem:[#allocation29_spill]] %s2394_s9  ;;  %s376_s8 = sshll.u32 %s366_s4, 4  ;;  %s377_s8 = int_to_ptr.vmem [resolvable:$true] %s376_s8 }
  0x46   : > { %s373_s15 = sadd.s32 %s1427_s6, %s1426_s5  ;;  %p2401_p5 = pnand %p2661_p9, %p2369_p1 }
  0x47   : > { %s1428_s22 = sshll.u32 %s373_s15, 6  ;;  %s2188_s23 = smov [#allocation10]  }
  0x48   : > { %s375_s1 = scalar_lea.hbm %s2635_s0, %s1428_s22  ;;  %s313_s16 = sshll.u32 %s2188_s23, 4  ;;  %s314_s16 = int_to_ptr.vmem [resolvable:$true] %s313_s16 }
  0x49   : > { %s2408_s9 = scalar_lea.sflag [#allocation5], %s362_s28  ;;  %p1940_p7 = pneg %p2401_p5 }
  0x4a   : > { %s1951_s4 = scalar_lea.vmem %s377_s8, 512  ;;  %s2189_s5 = smov [#allocation4]  }
  0x4b   : > { %p1952_p13 = scmp.ne.s32.totalorder %s377_s8, %s1951_s4  ;;  %s1956_s6 = sshll.u32 %s2189_s5, 4  ;;  %s1957_s6 = int_to_ptr.vmem [resolvable:$false] %s1956_s6 }
  0x4c   : > { %s1958_s15 = scalar_lea.vmem %s1957_s6, 1024  ;;  %p1959_p1 = scmp.lt.s32.totalorder %s377_s8, %s1957_s6 }
  0x4d   : > { %p1954_p0 = pnand %p1952_p13, %p1940_p7  ;;  %p1960_p9 = scmp.lt.s32.totalorder %s1958_s15, %s1951_s4 }
  0x4f   : > { %p1955_p3 = pneg %p1954_p0  ;;  %p1961_p12 = por %p1960_p9, %p1959_p1 }
  0x51   : > { %p1962_p11 = pnand %p1961_p12, %p1955_p3 }
  0x53   : > { %1965 = shalt.err (!%p1962_p11)
}
  0x54   : > { %s2689_s22 = smov 4   ;;  %s2690_s29 = smov 64  }
  0x55   : > { %1732 = dma.hbm_to_vmem [thread:$0]  (!%p2401_p5), %s375_s1, 512, %s377_s8, %s2408_s9, %s2690_s29, %s2690_s29, %s2689_s22  }
  0x56   : > { %s1977_s28 = scalar_lea.vmem %s314_s16, 3072  ;;  %p2691_p7 = pneg %p2328_p10 }
  0x57   : > { %p1978_p0 = scmp.ne.s32.totalorder %s314_s16, %s1977_s28  ;;  %p1985_p4 = scmp.lt.s32.totalorder %s314_s16, %s314_s16 }
  0x58   : > { %p1986_p2 = scmp.lt.s32.totalorder %s1977_s28, %s1977_s28 }
  0x59   : > { %p1980_p13 = pnand %p1978_p0, %p2691_p7 }
  0x5a   : > { %p1987_p9 = por %p1986_p2, %p1985_p4 }
  0x5b   : > { %p1981_p6 = pneg %p1980_p13 }
  0x5d   : > { %p1988_p3 = pnand %p1987_p9, %p1981_p6 }
  0x5f   : > { %1991 = shalt.err (!%p1988_p3)
}
  0x60   : > { %1722 = dma.hbm_to_vmem [thread:$0]  (!%p2328_p10), %s2638_s3, 3072, %s314_s16, [#allocation8], %s2690_s29, %s2690_s29, %s2689_s22  }
  0x61   : > { %s2190_s8 = smov [#allocation13]   ;;  %p2692_p12 = pmov %p2691_p7 }
  0x62   : > { %s345_s12 = sshll.u32 %s2190_s8, 4  ;;  %s346_s12 = int_to_ptr.vmem [resolvable:$true] %s345_s12 }
  0x63   : > { %s2003_s26 = scalar_lea.vmem %s346_s12, 1024  ;;  %p2011_p6 = scmp.lt.s32.totalorder %s346_s12, %s346_s12 }
  0x64   : > { %p2004_p11 = scmp.ne.s32.totalorder %s346_s12, %s2003_s26  ;;  %p2012_p5 = scmp.lt.s32.totalorder %s2003_s26, %s2003_s26 }
  0x66   : > { %p2006_p2 = pnand %p2004_p11, %p2692_p12  ;;  %p2013_p1 = por %p2012_p5, %p2011_p6 }
  0x68   : > { %p2007_p4 = pneg %p2006_p2 }
  0x6a   : > { %p2014_p0 = pnand %p2013_p1, %p2007_p4 }
  0x6c   : > { %2017 = shalt.err (!%p2014_p0)
}
  0x6d   : > { %1728 = dma.hbm_to_vmem [thread:$0]  (!%p2328_p10), %s2642_s7, 1024, %s346_s12, [#allocation12], %s2690_s29, %s2690_s29, %s2689_s22  }
  0x6e   : > { %s109_s16 = sadd.s32 1, %s2150_s11  ;;  %p116_p7 = scmp.ne.s32.totalorder %s2150_s11, %s2146_s10 }
  0x6f   : > { %p2693_p13 = scmp.eq.s32.totalorder %s2387_s25, 0  ;;  %p2694_p9 = scmp.eq.s32.totalorder %s2182_s19, 0 }
  0x70   : > { %p2695_p11 = scmp.eq.s32.totalorder %s2301_s20, 5  ;;  %s388_s5 = sand.u32 1, %s2150_s11  }
  0x71   : > { %s2446_s27 = scalar_select %p2693_p13, %s2150_s11, %s109_s16  }
  0x72   : > { %p118_p3 = por %p116_p7, %p2694_p9  ;;  %p2452_p12 = por %p2695_p11, %p116_p7 }
  0x73   : > { %s1493_s6 = sshll.u32 %s2178_s18, 9  ;;  %s1429_s15 = sshll.u32 %s388_s5, 5 }
  0x74   : > { %s396_s21 = scalar_lea.hbm %s2637_s2, %s1493_s6  ;;  %p2697_p10 = scmp.lt.s32.totalorder %s2182_s19, 6 }
  0x75   : > { %s390_s25 = scalar_lea.vmem [#allocation9], %s1429_s15  ;;  %s2191_s1 = smov [#allocation9]  }
  0x76   : > { %p2463_p2 = pnand %p2697_p10, %p118_p3  ;;  %s397_s12 = sshll.u32 %s390_s25, 4  ;;  %s398_s12 = int_to_ptr.vmem [resolvable:$true] %s397_s12 }
  0x77   : > { %s2031_s26 = scalar_lea.vmem %s398_s12, 512  ;;  %s2036_s23 = sshll.u32 %s2191_s1, 4  ;;  %s2037_s23 = int_to_ptr.vmem [resolvable:$false] %s2036_s23 }
  0x78   : > { %p2020_p4 = pneg %p2463_p2  ;;  %p2032_p6 = scmp.ne.s32.totalorder %s398_s12, %s2031_s26 }
  0x79   : > { %s2038_s16 = scalar_lea.vmem %s2037_s23, 1024  ;;  %p2039_p0 = scmp.lt.s32.totalorder %s398_s12, %s2037_s23 }
  0x7a   : > { %p2034_p5 = pnand %p2032_p6, %p2020_p4  ;;  %p2040_p7 = scmp.lt.s32.totalorder %s2038_s16, %s2031_s26 }
  0x7c   : > { %p2035_p1 = pneg %p2034_p5  ;;  %p2041_p13 = por %p2040_p7, %p2039_p0 }
  0x7e   : > { %p2042_p9 = pnand %p2041_p13, %p2035_p1 }
  0x80   : > { %2045 = shalt.err (!%p2042_p9)
}
  0x81   : > { %1735 = dma.hbm_to_vmem [thread:$0]  (!%p2463_p2), %s396_s21, 512, %s398_s12, %s2408_s9, %s2690_s29, %s2690_s29, %s2689_s22  }
  0x82   : > { %409 = sbr.rel (%p2320_p8) target bundleno = 1087 (0x43f), region = 56  ;;  %s2699_s5 = sld [smem:[#allocation28_spill]] (!%p2320_p8) }
  0x83   : > { %s411_s6 = sand.u32 (!%p2320_p8), 1, %s2301_s20   ;;  %s413_s15 = sand.u32 (!%p2320_p8), 1, %s2158_s13  }
  0x84   : > { %s1433_s28 = sshll.u32 (!%p2320_p8), %s413_s15, 5  ;;  %s412_s30 = scalar_lea.sflag (!%p2320_p8), [#allocation5], %s411_s6 }
  0x85   : > { %s2479_s25 = scalar_lea.vmem (!%p2320_p8), [#allocation4], %s1433_s28 }
  0x88   : > { %p2700_p3 = scmp.ne.s32.totalorder %s2699_s5, 0 }
  0x8a   : > { %2117 = dma.done.wait (%p2700_p3), %s412_s30, 512  }
  0x8b   : > { %2119 = vsyncadd (%p2700_p3), %s412_s30, 4294966784  ;;  %p2701_p11 = scmp.eq.s32.totalorder %s2301_s20, 0 }
  0x8d   : > { %2121 = dma.done.wait (%p2701_p11), [#allocation8], 1024   ;;  %p2702_p10 = pmov %p2701_p11 }
  0x8e   : > { %s2703_s24 = sld [smem:[#allocation24_spill]]  ;;  %s2490_s9 = sand.u32 1, %s2146_s10  }
  0x8f   : > { %2123 = vsyncadd (%p2702_p10), [#allocation8], 4294966272  ;;  %s1435_s22 = sshll.u32 %s2490_s9, 5 }
  0x90   : > { %s2493_s29 = scalar_lea.vmem [#allocation9], %s1435_s22 }
  0x94   : > { %p2704_p8 = scmp.ne.s32.totalorder %s2703_s24, 0 }
  0x96   : > { %2125 = dma.done.wait (%p2704_p8), %s412_s30, 512  }
  0x97   : > { %2127 = vsyncadd (%p2704_p8), %s412_s30, 4294966784  ;;  %p2705_p2 = pmov %p2702_p10 }
  0x99   : > { %2129 = dma.done.wait (%p2705_p2), [#allocation8], 3072   ;;  %p2706_p4 = pmov %p2705_p2 }
  0x9a   : > { %p2707_p6 = pmov %p2705_p2 }
  0x9b   : > { %2131 = vsyncadd (%p2706_p4), [#allocation8], 4294964224 }
  0x9c   : > { %2133 = dma.done.wait (%p2707_p6), [#allocation12], 4096   ;;  %p2708_p5 = pmov %p2705_p2 }
  0x9d   : > { %s2709_s21 = sld [smem:[#allocation22_spill]]  ;;  %s1439_s8 = sshll.u32 %s2490_s9, 6 }
  0x9e   : > { %2135 = vsyncadd (%p2708_p5), [#allocation12], 4294963200  ;;  %s2509_s12 = scalar_lea.vmem [#allocation14], %s1439_s8 }
  0xa3   : > { %p485_p1 = scmp.eq.s32.totalorder %s2709_s21, 0 }
  0xa4   : > { %v1846_v0 = vld [vmem:[#allocation13 + $0x38] sm:$0xff] (%p485_p1)   ;;  %v1847_v1 = vld [vmem:[#allocation13 + $0x30] sm:$0xff] (%p485_p1)   ;;  %v1848_v2 = vld [vmem:[#allocation13 + $0x28] sm:$0xff] (%p485_p1)   ;;  %s2710_s1 = sld [smem:[#allocation34_spill]] (%p485_p1) }
  0xa5   : > { %490 = sbr.rel (!%p485_p1) target bundleno = 399 (0x18f), region = 84  ;;  %1566 = vmatprep.subr.bf16.mxu0 (%p485_p1), %v1846_v0  ;;  %1662 = vmatprep.subr.bf16.mxu1 (%p485_p1), %v1846_v0  ;;  %v1849_v3 = vld [vmem:[#allocation13 + $0x20] sm:$0xff] (%p485_p1)   ;;  %v1855_v5 = vld [vmem:[%s2493_s29 + $0x10] sm:$0xff] (%p485_p1)   ;;  %v1850_v6 = vld [vmem:[#allocation13 + $0x18] sm:$0xff] (%p485_p1)  }
  0xa6   : > { %1567 = vmatpush3.bf16.msra.mxu0 (%p485_p1), %v1846_v0  ;;  %1670 = vmatpush3.bf16.msra.mxu1 (%p485_p1), %v1846_v0  ;;  %v1854_v4 = vld [vmem:[%s2493_s29] sm:$0xff] (%p485_p1)   ;;  %v1851_v7 = vld [vmem:[#allocation13 + $0x10] sm:$0xff] (%p485_p1)   ;;  %v1852_v8 = vld [vmem:[#allocation13 + $0x8] sm:$0xff] (%p485_p1)  }
  0xa7   : > { %1568 = vmatprep.subr.bf16.mxu0 (%p485_p1), %v1847_v1  ;;  %1663 = vmatprep.subr.bf16.mxu1 (%p485_p1), %v1847_v1  ;;  %v1853_v9 = vld [vmem:[#allocation13] sm:$0xff] (%p485_p1)   ;;  %v1856_v10 = vld [vmem:[%s2493_s29 + $0x8] sm:$0xff] (%p485_p1)   ;;  %v1857_v11 = vld [vmem:[%s2493_s29 + $0x18] sm:$0xff] (%p485_p1)  }
  0xa8   : > { %1582 = vmatprep.mubr.bf16.mxu0 (%p485_p1), %v1854_v4  ;;  %1586 = vmatprep.mubr.bf16.mxu1 (%p485_p1), %v1855_v5 }
  0xaa   : > { %1569 = vmatpush3.bf16.msra.mxu0 %v1847_v1  ;;  %1671 = vmatpush3.bf16.msra.mxu1 %v1847_v1  ;;  %v1441_v12 = vld [vmem:[%s2710_s1] ss:$0 sm:$0xff] }
  0xab   : > { %1570 = vmatprep.subr.bf16.mxu0 %v1848_v2  ;;  %1664 = vmatprep.subr.bf16.mxu1 %v1848_v2 }
  0xae   : > { %1571 = vmatpush3.bf16.msra.mxu0 %v1848_v2  ;;  %1672 = vmatpush3.bf16.msra.mxu1 %v1848_v2 }
  0xaf   : > { %1572 = vmatprep.subr.bf16.mxu0 %v1849_v3  ;;  %1665 = vmatprep.subr.bf16.mxu1 %v1849_v3 }
  0xb2   : > { %1573 = vmatpush3.bf16.msra.mxu0 %v1849_v3  ;;  %1673 = vmatpush3.bf16.msra.mxu1 %v1849_v3 }
  0xb3   : > { %1574 = vmatprep.subr.bf16.mxu0 %v1850_v6  ;;  %1666 = vmatprep.subr.bf16.mxu1 %v1850_v6 }
  0xb6   : > { %1575 = vmatpush3.bf16.msra.mxu0 %v1850_v6  ;;  %1674 = vmatpush3.bf16.msra.mxu1 %v1850_v6 }
  0xb7   : > { %1576 = vmatprep.subr.bf16.mxu0 %v1851_v7  ;;  %1667 = vmatprep.subr.bf16.mxu1 %v1851_v7 }
  0xba   : > { %1577 = vmatpush3.bf16.msra.mxu0 %v1851_v7  ;;  %1675 = vmatpush3.bf16.msra.mxu1 %v1851_v7 }
  0xbb   : > { %1578 = vmatprep.subr.bf16.mxu0 %v1852_v8  ;;  %1668 = vmatprep.subr.bf16.mxu1 %v1852_v8 }
  0xbe   : > { %1579 = vmatpush3.bf16.msra.mxu0 %v1852_v8  ;;  %1676 = vmatpush3.bf16.msra.mxu1 %v1852_v8 }
  0xbf   : > { %1580 = vmatprep.subr.bf16.mxu0 %v1853_v9  ;;  %1669 = vmatprep.subr.bf16.mxu1 %v1853_v9 }
  0xc2   : > { %1581 = vmatpush3.bf16.msra.mxu0 %v1853_v9  ;;  %1677 = vmatpush3.bf16.msra.mxu1 %v1853_v9 }
  0xc5   : > { %1583 = vmatmul.mubr.bf16.vlgmr.msra.gmra.mxu0 %v1856_v10  ;;  %1587 = vmatmul.mubr.bf16.vlgmr.msra.gmra.mxu1 %v1857_v11 }
 0x185   : > { %v1584_v13 = vpop.f32.mrf.mxu0  ;;  %v1588_v14 = vpop.f32.mrf.mxu1 }
 0x186   : > { %v637_v15 = vadd.f32 %v1584_v13, %v1441_v12  ;;  %v653_v16 = vadd.f32 %v1588_v14, %v1441_v12 }
 0x187   : > { %v628_v17 = vpop.f32.mrf.mxu0  ;;  %v644_v18 = vpop.f32.mrf.mxu1 }
 0x188   : > { %661 = vst [vmem:[#allocation2 + $0x18] sm:$0xff] %v637_v15  ;;  %665 = vst [vmem:[#allocation2 + $0x28] sm:$0xff] %v653_v16  ;;  %v629_v19 = vadd.f32 %v1441_v12, %v628_v17  ;;  %v645_v20 = vadd.f32 %v1441_v12, %v644_v18 }
 0x189   : > { %v1585_v21 = vpop.f32.mrf.mxu0  ;;  %v1589_v22 = vpop.f32.mrf.mxu1 }
 0x18a   : > { %659 = vst [vmem:[#allocation2 + $0x30] sm:$0xff] %v629_v19  ;;  %663 = vst [vmem:[#allocation2 + $0x8] sm:$0xff] %v645_v20  ;;  %v640_v23 = vadd.f32 %v1585_v21, %v1441_v12  ;;  %v656_v24 = vadd.f32 %v1589_v22, %v1441_v12 }
 0x18b   : > { %v631_v25 = vpop.f32.mrf.mxu0  ;;  %v647_v26 = vpop.f32.mrf.mxu1 }
 0x18c   : > { %662 = vst [vmem:[#allocation2 + $0x10] sm:$0xff] %v640_v23  ;;  %666 = vst [vmem:[#allocation2 + $0x38] sm:$0xff] %v656_v24  ;;  %v632_v27 = vadd.f32 %v1441_v12, %v631_v25  ;;  %v648_v28 = vadd.f32 %v1441_v12, %v647_v26 }
 0x18e   : > { %660 = vst [vmem:[#allocation2] sm:$0xff] %v632_v27  ;;  %664 = vst [vmem:[#allocation2 + $0x20] sm:$0xff] %v648_v28 }
 0x18f PF: > { %v1858_v29 = vld [vmem:[#allocation7 + $0x38] sm:$0xff]   ;;  %s2711_s23 = sld [smem:[#allocation22_spill]]  ;;  %v1859_v30 = vld [vmem:[#allocation7 + $0x30] sm:$0xff]   ;;  %v1860_v31 = vld [vmem:[#allocation7 + $0x28] sm:$0xff]  }
 0x190   : > { %1590 = vmatprep.subr.bf16.mxu0 %v1858_v29  ;;  %v1861_v32 = vld [vmem:[#allocation7 + $0x20] sm:$0xff]   ;;  %v1862_v34 = vld [vmem:[#allocation7 + $0x18] sm:$0xff]   ;;  %v1863_v37 = vld [vmem:[#allocation7 + $0x10] sm:$0xff]   ;;  %s2712_s30 = sld [smem:[#allocation31_spill]] }
 0x191   : > { %1591 = vmatpush3.bf16.msra.mxu0 %v1858_v29  ;;  %v1866_v33 = vld [vmem:[%s2479_s25] sm:$0xff]   ;;  %v1864_v39 = vld [vmem:[#allocation7 + $0x8] sm:$0xff]   ;;  %v1868_v44 = vld [vmem:[%s2479_s25 + $0x10] sm:$0xff]  }
 0x192   : > { %1592 = vmatprep.subr.bf16.mxu0 %v1859_v30  ;;  %1606 = vmatprep.mubr.bf16.mxu0 %v1866_v33  ;;  %v1865_v41 = vld [vmem:[#allocation7] sm:$0xff]   ;;  %v1867_v43 = vld [vmem:[%s2479_s25 + $0x8] sm:$0xff]   ;;  %v1869_v45 = vld [vmem:[%s2479_s25 + $0x18] sm:$0xff]  }
 0x193   : > { %v1500_v54 = vld [vmem:[%s2493_s29] sm:$0xff]   ;;  %v1515_v55 = vld [vmem:[%s2493_s29 + $0x8] sm:$0xff]   ;;  %v1516_v3 = vld [vmem:[%s2493_s29 + $0x10] sm:$0xff]  }
 0x194   : > { %v1506_v56 = vunpack.c.h.bf16 %v1515_v55  ;;  %v1501_v57 = vunpack.c.l.bf16 %v1500_v54  ;;  %v1502_v58 = vunpack.c.h.bf16 %v1500_v54  ;;  %v1505_v60 = vunpack.c.l.bf16 %v1515_v55  ;;  %v1517_v4 = vld [vmem:[%s2493_s29 + $0x18] sm:$0xff]   ;;  %s2713_s29 = sld [smem:[#allocation33_spill]] }
 0x195   : > { %s1495_s16 = sshll.u32 %s2711_s23, 6  ;;  %1593 = vmatpush3.bf16.msra.mxu0 %v1859_v30  ;;  %v1514_v7 = vunpack.c.h.bf16 %v1517_v4  ;;  %v1509_v10 = vunpack.c.l.bf16 %v1516_v3  ;;  %v1510_v11 = vunpack.c.h.bf16 %v1516_v3  ;;  %v1513_v14 = vunpack.c.l.bf16 %v1517_v4  ;;  %p1225_p0 = scmp.eq.s32.totalorder %s2711_s23, 2  ;;  %v1201_v3 = vld [vmem:[#allocation2 + $0x30] sm:$0xff] }
 0x196   : > { %1594 = vmatprep.subr.bf16.mxu0 %v1860_v31  ;;  %s2520_s5 = scalar_lea.vmem [#allocation10], %s1495_s16  ;;  %s2526_s6 = scalar_lea.vmem [#allocation11], %s1495_s16  ;;  %v885_v62 = vmul.f32 1.1, %v1506_v56  ;;  %v882_v63 = vmul.f32 1.1, %v1501_v57 }
 0x197   : > { %v1870_v35 = vld [vmem:[%s2520_s5 + $0x38] sm:$0xff]   ;;  %v1871_v36 = vld [vmem:[%s2520_s5 + $0x30] sm:$0xff]   ;;  %v1872_v38 = vld [vmem:[%s2520_s5 + $0x28] sm:$0xff]   ;;  %v883_v0 = vmul.f32 1.1, %v1502_v58  ;;  %s929_s25 = scalar_lea.vmem %s2712_s30, %s2711_s23 }
 0x198   : > { %1614 = vmatprep.subr.bf16.mxu1 %v1870_v35  ;;  %v1873_v40 = vld [vmem:[%s2520_s5 + $0x20] sm:$0xff]   ;;  %v1874_v42 = vld [vmem:[%s2520_s5 + $0x18] sm:$0xff]   ;;  %v1875_v46 = vld [vmem:[%s2520_s5 + $0x10] sm:$0xff]   ;;  %v884_v1 = vmul.f32 1.1, %v1505_v60 }
 0x199   : > { %1595 = vmatpush3.bf16.msra.mxu0 %v1860_v31  ;;  %1615 = vmatpush3.bf16.msra.mxu1 %v1870_v35  ;;  %v1876_v47 = vld [vmem:[%s2520_s5 + $0x8] sm:$0xff]   ;;  %v1877_v48 = vld [vmem:[%s2520_s5] sm:$0xff]   ;;  %v1878_v49 = vld [vmem:[%s2526_s6 + $0x38] sm:$0xff]   ;;  %v889_v18 = vmul.f32 1.1, %v1514_v7 }
 0x19a   : > { %1596 = vmatprep.subr.bf16.mxu0 %v1861_v32  ;;  %1616 = vmatprep.subr.bf16.mxu1 %v1871_v36  ;;  %v1879_v50 = vld [vmem:[%s2526_s6 + $0x30] sm:$0xff]   ;;  %v1880_v51 = vld [vmem:[%s2526_s6 + $0x28] sm:$0xff]   ;;  %v1881_v52 = vld [vmem:[%s2526_s6 + $0x20] sm:$0xff]   ;;  %v886_v19 = vmul.f32 1.1, %v1509_v10  ;;  %s1080_s21 = scalar_lea.vmem %s2713_s29, %s2711_s23 }
 0x19b   : > { %v1882_v53 = vld [vmem:[%s2526_s6 + $0x18] sm:$0xff]   ;;  %v887_v20 = vmul.f32 1.1, %v1510_v11  ;;  %v888_v21 = vmul.f32 1.1, %v1513_v14  ;;  %v1883_v30 = vld [vmem:[%s2526_s6 + $0x10] sm:$0xff]  }
 0x19c   : > { %v1884_v31 = vld [vmem:[%s2526_s6 + $0x8] sm:$0xff]   ;;  %v1468_v35 = vld [vmem:[%s929_s25] ss:$0 sm:$0xff]  ;;  %v1204_v7 = vld [vmem:[#allocation2 + $0x10] sm:$0xff] }
 0x19d   : > { %1597 = vmatpush3.bf16.msra.mxu0 %v1861_v32  ;;  %1617 = vmatpush3.bf16.msra.mxu1 %v1871_v36  ;;  %v1885_v32 = vld [vmem:[%s2526_s6] sm:$0xff]  }
 0x19e   : > { %1598 = vmatprep.subr.bf16.mxu0 %v1862_v34  ;;  %1618 = vmatprep.subr.bf16.mxu1 %v1872_v38  ;;  %v1202_v11 = vld [vmem:[#allocation2] sm:$0xff] }
 0x1a1   : > { %1599 = vmatpush3.bf16.msra.mxu0 %v1862_v34  ;;  %1619 = vmatpush3.bf16.msra.mxu1 %v1872_v38 }
 0x1a2   : > { %1600 = vmatprep.subr.bf16.mxu0 %v1863_v37  ;;  %1620 = vmatprep.subr.bf16.mxu1 %v1873_v40 }
 0x1a5   : > { %1601 = vmatpush3.bf16.msra.mxu0 %v1863_v37  ;;  %1621 = vmatpush3.bf16.msra.mxu1 %v1873_v40 }
 0x1a6   : > { %1602 = vmatprep.subr.bf16.mxu0 %v1864_v39  ;;  %1622 = vmatprep.subr.bf16.mxu1 %v1874_v42 }
 0x1a9   : > { %1603 = vmatpush3.bf16.msra.mxu0 %v1864_v39  ;;  %1623 = vmatpush3.bf16.msra.mxu1 %v1874_v42 }
 0x1aa   : > { %1604 = vmatprep.subr.bf16.mxu0 %v1865_v41  ;;  %1624 = vmatprep.subr.bf16.mxu1 %v1875_v46 }
 0x1ad   : > { %1605 = vmatpush3.bf16.msra.mxu0 %v1865_v41  ;;  %1625 = vmatpush3.bf16.msra.mxu1 %v1875_v46 }
 0x1ae   : > { %1626 = vmatprep.subr.bf16.mxu1 %v1876_v47  ;;  %1638 = vmatprep.subr.bf16.mxu0 %v1878_v49 }
 0x1b0   : > { %1607 = vmatmul.mubr.bf16.vlgmr.msra.gmra.mxu0 %v1867_v43 }
 0x1b1   : > { %1610 = vmatprep.mubr.bf16.mxu0 %v1868_v44  ;;  %1627 = vmatpush3.bf16.msra.mxu1 %v1876_v47 }
 0x1b2   : > { %1628 = vmatprep.subr.bf16.mxu1 %v1877_v48  ;;  %1639 = vmatpush3.bf16.msra.mxu0 %v1878_v49 }
 0x1b3   : > { %1640 = vmatprep.subr.bf16.mxu0 %v1879_v50 }
 0x1b5   : > { %1629 = vmatpush3.bf16.msra.mxu1 %v1877_v48 }
 0x1b6   : > { %1678 = vmatprep.subr.bf16.mxu1 %v1878_v49  ;;  %1641 = vmatpush3.bf16.msra.mxu0 %v1879_v50 }
 0x1b7   : > { %1642 = vmatprep.subr.bf16.mxu0 %v1880_v51 }
 0x1b8   : > { %1611 = vmatmul.mubr.bf16.gmra.mxu0 %v1869_v45 }
 0x1ba   : > { %1643 = vmatpush3.bf16.msra.mxu0 %v1880_v51 }
 0x1bb   : > { %1644 = vmatprep.subr.bf16.mxu0 %v1881_v52 }
 0x1be   : > { %1645 = vmatpush3.bf16.msra.mxu0 %v1881_v52 }
 0x1bf   : > { %1646 = vmatprep.subr.bf16.mxu0 %v1882_v53 }
 0x1c2   : > { %1647 = vmatpush3.bf16.msra.mxu0 %v1882_v53 }
 0x1c3   : > { %1648 = vmatprep.subr.bf16.mxu0 %v1883_v30 }
 0x1c6   : > { %1649 = vmatpush3.bf16.msra.mxu0 %v1883_v30 }
 0x1c7   : > { %1650 = vmatprep.subr.bf16.mxu0 %v1884_v31 }
 0x1ca   : > { %1651 = vmatpush3.bf16.msra.mxu0 %v1884_v31 }
 0x1cb   : > { %1652 = vmatprep.subr.bf16.mxu0 %v1885_v32 }
 0x1ce   : > { %1653 = vmatpush3.bf16.msra.mxu0 %v1885_v32 }
 0x270   : > { %v1608_v59 = vpop.f32.mrf.mxu0 }
 0x271   : > { %v900_v12 = vadd.f32 %v1608_v59, %v884_v1 }
 0x272   : > { %v816_v61 = vpop.f32.mrf.mxu0 }
 0x273   : > { %v898_v8 = vadd.f32 %v882_v63, %v816_v61 }
 0x274   : > { %v1609_v2 = vpop.f32.mrf.mxu0 }
 0x275   : > { %v901_v5 = vadd.f32 %v1609_v2, %v885_v62  ;;  %v1478_v62 = vld [vmem:[%s1080_s21] ss:$0 sm:$0xff] }
 0x276   : > { %v819_v6 = vpop.f32.mrf.mxu0 }
 0x277   : > { %v899_v9 = vadd.f32 %v883_v0, %v819_v6  ;;  %v907_v16 = vpack.c.bf16 %v901_v5, %v900_v12  ;;  %v1203_v0 = vld [vmem:[#allocation2 + $0x18] sm:$0xff] }
 0x278   : > { %v1612_v13 = vpop.f32.mrf.mxu0 }
 0x279   : > { %v906_v15 = vpack.c.bf16 %v899_v9, %v898_v8  ;;  %v904_v27 = vadd.f32 %v1612_v13, %v888_v21 }
 0x27a   : > { %v832_v17 = vpop.f32.mrf.mxu0 }
 0x27b   : > { %1630 = vmatprep.mubr.bf16.mxu1 %v906_v15  ;;  %v902_v25 = vadd.f32 %v886_v19, %v832_v17  ;;  %v1207_v15 = vld [vmem:[#allocation2 + $0x28] sm:$0xff] }
 0x27c   : > { %v1613_v22 = vpop.f32.mrf.mxu0  ;;  %1631 = vmatmul.mubr.bf16.vlgmr.msra.gmra.mxu1 %v907_v16  ;;  %v1205_v19 = vld [vmem:[#allocation2 + $0x8] sm:$0xff] }
 0x27d   : > { %1686 = vmatpush3.bf16.msra.mxu1 %v1878_v49  ;;  %v905_v23 = vadd.f32 %v1613_v22, %v889_v18 }
 0x27e   : > { %v835_v24 = vpop.f32.mrf.mxu0  ;;  %1679 = vmatprep.subr.bf16.mxu1 %v1879_v50 }
 0x27f   : > { %v903_v26 = vadd.f32 %v887_v20, %v835_v24  ;;  %v909_v29 = vpack.c.bf16 %v905_v23, %v904_v27  ;;  %v1208_v23 = vld [vmem:[#allocation2 + $0x38] sm:$0xff]  ;;  %v1206_v27 = vld [vmem:[#allocation2 + $0x20] sm:$0xff] }
 0x281   : > { %v908_v28 = vpack.c.bf16 %v903_v26, %v902_v25  ;;  %1687 = vmatpush3.bf16.msra.mxu1 %v1879_v50 }
 0x282   : > { %1680 = vmatprep.subr.bf16.mxu1 %v1880_v51 }
 0x283   : > { %1634 = vmatprep.mubr.bf16.mxu1 %v908_v28 }
 0x284   : > { %1635 = vmatmul.mubr.bf16.gmra.mxu1 %v909_v29 }
 0x285   : > { %1688 = vmatpush3.bf16.msra.mxu1 %v1880_v51 }
 0x286   : > { %1681 = vmatprep.subr.bf16.mxu1 %v1881_v52 }
 0x289   : > { %1689 = vmatpush3.bf16.msra.mxu1 %v1881_v52 }
 0x28a   : > { %1682 = vmatprep.subr.bf16.mxu1 %v1882_v53 }
 0x28d   : > { %1690 = vmatpush3.bf16.msra.mxu1 %v1882_v53 }
 0x28e   : > { %1683 = vmatprep.subr.bf16.mxu1 %v1883_v30 }
 0x291   : > { %1691 = vmatpush3.bf16.msra.mxu1 %v1883_v30 }
 0x292   : > { %1684 = vmatprep.subr.bf16.mxu1 %v1884_v31 }
 0x295   : > { %1692 = vmatpush3.bf16.msra.mxu1 %v1884_v31 }
 0x296   : > { %1685 = vmatprep.subr.bf16.mxu1 %v1885_v32 }
 0x299   : > { %1693 = vmatpush3.bf16.msra.mxu1 %v1885_v32 }
 0x33c   : > { %v1632_v33 = vpop.f32.mrf.mxu1 }
 0x33d   : > { %v1028_v39 = vadd.f32 %v1632_v33, %v1468_v35 }
 0x33e   : > { %v1019_v34 = vpop.f32.mrf.mxu1 }
 0x33f   : > { %v1020_v37 = vadd.f32 %v1468_v35, %v1019_v34  ;;  %v1052_v46 = vmax.f32 %v1028_v39, 0.0 }
 0x340   : > { %v1633_v36 = vpop.f32.mrf.mxu1 }
 0x341   : > { %v1031_v38 = vadd.f32 %v1633_v36, %v1468_v35  ;;  %v1050_v44 = vmax.f32 %v1020_v37, 0.0 }
 0x342   : > { %v1022_v40 = vpop.f32.mrf.mxu1 }
 0x343   : > { %v1023_v41 = vadd.f32 %v1468_v35, %v1022_v40  ;;  %v1053_v42 = vmax.f32 %v1031_v38, 0.0 }
 0x344   : > { %v1636_v43 = vpop.f32.mrf.mxu1 }
 0x345   : > { %v1051_v45 = vmax.f32 %v1023_v41, 0.0  ;;  %v1059_v49 = vpack.c.bf16 %v1053_v42, %v1052_v46  ;;  %v1044_v53 = vadd.f32 %v1636_v43, %v1468_v35 }
 0x346   : > { %v1035_v47 = vpop.f32.mrf.mxu1 }
 0x347   : > { %v1058_v48 = vpack.c.bf16 %v1051_v45, %v1050_v44  ;;  %v1036_v51 = vadd.f32 %v1468_v35, %v1035_v47  ;;  %v1056_v59 = vmax.f32 %v1044_v53, 0.0 }
 0x348   : > { %v1637_v50 = vpop.f32.mrf.mxu1 }
 0x349   : > { %v1047_v52 = vadd.f32 %v1637_v50, %v1468_v35  ;;  %1654 = vmatprep.mubr.bf16.mxu0 %v1058_v48  ;;  %v1054_v57 = vmax.f32 %v1036_v51, 0.0 }
 0x34a   : > { %v1038_v54 = vpop.f32.mrf.mxu1  ;;  %1655 = vmatmul.mubr.bf16.vlgmr.msra.gmra.mxu0 %v1059_v49 }
 0x34b   : > { %v1039_v55 = vadd.f32 %v1468_v35, %v1038_v54  ;;  %v1057_v56 = vmax.f32 %v1047_v52, 0.0 }
 0x34d   : > { %v1055_v58 = vmax.f32 %v1039_v55, 0.0  ;;  %v1061_v61 = vpack.c.bf16 %v1057_v56, %v1056_v59 }
 0x34f   : > { %v1060_v60 = vpack.c.bf16 %v1055_v58, %v1054_v57 }
 0x351   : > { %1658 = vmatprep.mubr.bf16.mxu1 %v1060_v60 }
 0x352   : > { %1659 = vmatmul.mubr.bf16.vlgmr.msra.gmra.mxu1 %v1061_v61 }
 0x40a   : > { %v1656_v63 = vpop.f32.mrf.mxu0 }
 0x40b   : > { %v1179_v1 = vadd.f32 %v1656_v63, %v1478_v62 }
 0x40c   : > { %v1170_v2 = vpop.f32.mrf.mxu0 }
 0x40d   : > { %v1211_v4 = vadd.f32 %v1203_v0, %v1179_v1  ;;  %v1171_v5 = vadd.f32 %v1478_v62, %v1170_v2 }
 0x40e   : > { %v1657_v6 = vpop.f32.mrf.mxu0 }
 0x40f   : > { %1219 = vst [vmem:[#allocation2 + $0x18] sm:$0xff] %v1211_v4  ;;  %v1209_v8 = vadd.f32 %v1201_v3, %v1171_v5  ;;  %v1182_v9 = vadd.f32 %v1657_v6, %v1478_v62 }
 0x410   : > { %v1173_v10 = vpop.f32.mrf.mxu0 }
 0x411   : > { %1217 = vst [vmem:[#allocation2 + $0x30] sm:$0xff] %v1209_v8  ;;  %v1212_v12 = vadd.f32 %v1204_v7, %v1182_v9  ;;  %v1174_v13 = vadd.f32 %v1478_v62, %v1173_v10 }
 0x412   : > { %v1660_v14 = vpop.f32.mrf.mxu1 }
 0x413   : > { %1220 = vst [vmem:[#allocation2 + $0x10] sm:$0xff] %v1212_v12  ;;  %v1210_v16 = vadd.f32 %v1202_v11, %v1174_v13  ;;  %v1195_v17 = vadd.f32 %v1660_v14, %v1478_v62 }
 0x414   : > { %v1186_v18 = vpop.f32.mrf.mxu1 }
 0x415   : > { %1218 = vst [vmem:[#allocation2] sm:$0xff] %v1210_v16  ;;  %v1215_v20 = vadd.f32 %v1207_v15, %v1195_v17  ;;  %v1187_v21 = vadd.f32 %v1478_v62, %v1186_v18 }
 0x416   : > { %v1661_v22 = vpop.f32.mrf.mxu1  ;;  %v1232_v33 = vld [vmem:[#allocation2 + $0x18] sm:$0xff] (%p1225_p0) }
 0x417   : > { %1223 = vst [vmem:[#allocation2 + $0x28] sm:$0xff] %v1215_v20  ;;  %v1213_v24 = vadd.f32 %v1205_v19, %v1187_v21  ;;  %v1198_v25 = vadd.f32 %v1661_v22, %v1478_v62  ;;  %1240 = vst [vmem:[%s2509_s12 + $0x10] sm:$0xff] (%p1225_p0), %v1232_v33 }
 0x418   : > { %v1189_v26 = vpop.f32.mrf.mxu1  ;;  %v1230_v31 = vld [vmem:[#allocation2 + $0x30] sm:$0xff] (%p1225_p0) }
 0x419   : > { %1221 = vst [vmem:[#allocation2 + $0x8] sm:$0xff] %v1213_v24  ;;  %v1216_v28 = vadd.f32 %v1208_v23, %v1198_v25  ;;  %v1190_v29 = vadd.f32 %v1478_v62, %v1189_v26  ;;  %1229 = sbr.rel (!%p1225_p0) target bundleno = 1062 (0x426), region = 96  ;;  %1238 = vst [vmem:[%s2509_s12] sm:$0xff] (%p1225_p0), %v1230_v31 }
 0x41a   : > { %v1233_v34 = vld [vmem:[#allocation2 + $0x10] sm:$0xff] (%p1225_p0) }
 0x41b   : > { %1224 = vst [vmem:[#allocation2 + $0x38] sm:$0xff] %v1216_v28  ;;  %v1214_v30 = vadd.f32 %v1206_v27, %v1190_v29  ;;  %1241 = vst [vmem:[%s2509_s12 + $0x18] sm:$0xff] (%p1225_p0), %v1233_v34 }
 0x41c   : > { %v1231_v32 = vld [vmem:[#allocation2] sm:$0xff] (%p1225_p0) }
 0x41d   : > { %1222 = vst [vmem:[#allocation2 + $0x20] sm:$0xff] %v1214_v30  ;;  %1239 = vst [vmem:[%s2509_s12 + $0x8] sm:$0xff] (%p1225_p0), %v1231_v32 }
 0x41e   : > { %v1236_v37 = vld [vmem:[#allocation2 + $0x28] sm:$0xff] }
 0x41f   : > { %1244 = vst [vmem:[%s2509_s12 + $0x30] sm:$0xff] %v1236_v37 }
 0x420   : > { %v1234_v35 = vld [vmem:[#allocation2 + $0x8] sm:$0xff] }
 0x421   : > { %1242 = vst [vmem:[%s2509_s12 + $0x20] sm:$0xff] %v1234_v35 }
 0x422   : > { %v1237_v38 = vld [vmem:[#allocation2 + $0x38] sm:$0xff] }
 0x423   : > { %1245 = vst [vmem:[%s2509_s12 + $0x38] sm:$0xff] %v1237_v38 }
 0x424   : > { %v1235_v36 = vld [vmem:[#allocation2 + $0x20] sm:$0xff] }
 0x425   : > { %1243 = vst [vmem:[%s2509_s12 + $0x28] sm:$0xff] %v1235_v36 }
 0x426 PF: > { %s2714_s8 = sld [smem:[#allocation23_spill]]  ;;  %s1260_s5 = sshll.u32 %s2509_s12, 4  ;;  %s2573_s5 = int_to_ptr.vmem [resolvable:$true] %s1260_s5 }
 0x427   : > { %s2715_s23 = sld [smem:[#allocation35_spill]]  ;;  %s1247_s6 = scalar_lea.sflag [#allocation6], %s2490_s9 }
 0x428   : > { %s2046_s15 = scalar_lea.vmem %s2573_s5, 1024  ;;  %s2192_s28 = smov [#allocation14]  }
 0x429   : > { %p2047_p7 = scmp.ne.s32.totalorder %s2573_s5, %s2046_s15  ;;  %s2050_s30 = sshll.u32 %s2192_s28, 4  ;;  %s2051_s30 = int_to_ptr.vmem [resolvable:$false] %s2050_s30 }
 0x42a   : > { %s2052_s25 = scalar_lea.vmem %s2051_s30, 2048  ;;  %p2053_p3 = scmp.lt.s32.totalorder %s2573_s5, %s2051_s30 }
 0x42b   : > { %p2048_p13 = pnand %p2047_p7, %p2452_p12  ;;  %p2054_p11 = scmp.lt.s32.totalorder %s2052_s25, %s2046_s15 }
 0x42c   : > { %s1498_s20 = sshll.u32 %s2714_s8, 10 }
 0x42d   : > { %s2570_s16 = scalar_lea.hbm %s2715_s23, %s1498_s20  ;;  %p2049_p9 = pneg %p2048_p13 }
 0x42e   : > { %p2055_p10 = por %p2054_p11, %p2053_p3 }
 0x430   : > { %p2056_p8 = pnand %p2055_p10, %p2049_p9 }
 0x432   : > { %2059 = shalt.err (!%p2056_p8)
}
 0x433   : > { %s2060_s12 = scalar_lea.hbm %s2570_s16, 1024  ;;  %s2064_s29 = scalar_lea.hbm %s2715_s23, 2048 }
 0x434   : > { %p2061_p2 = scmp.ne.s32.totalorder %s2570_s16, %s2060_s12  ;;  %p2065_p5 = scmp.lt.s32.totalorder %s2570_s16, %s2715_s23 }
 0x435   : > { %p2066_p1 = scmp.lt.s32.totalorder %s2064_s29, %s2060_s12 }
 0x436   : > { %p2062_p4 = pnand %p2061_p2, %p2452_p12 }
 0x437   : > { %p2067_p0 = por %p2066_p1, %p2065_p5 }
 0x438   : > { %p2063_p6 = pneg %p2062_p4 }
 0x43a   : > { %p2068_p7 = pnand %p2067_p0, %p2063_p6 }
 0x43c   : > { %2071 = shalt.err (!%p2068_p7)
}
 0x43d   : > { %s2193_s20 = smov 128   ;;  %s2194_s26 = smov 8  }
 0x43e   : > { %1714 = dma.vmem_to_hbm [thread:$0]  (%p2452_p12), %s2573_s5, 1024, %s2570_s16, %s1247_s6, %s2193_s20, %s2193_s20, %s2194_s26  }
 0x43f PF: > { %s2716_s1 = sld [smem:[#allocation21_spill]]  ;;  %p1749_p13 = scmp.ge.s32.totalorder %s2182_s19, 2 }
 0x440   : > { %s2717_s15 = sld [smem:[#allocation25_spill]] }
 0x445   : > { %s1275_s28 = sand.u32 1, %s2716_s1  }
 0x446   : > { %p2718_p9 = scmp.ne.s32.totalorder %s2717_s15, 0  ;;  %s1276_s30 = scalar_lea.sflag [#allocation6], %s1275_s28 }
 0x448   : > { %p1737_p3 = pnand %p1749_p13, %p2718_p9 }
 0x44a   : > { %p1738_p11 = pneg %p1737_p3 }
 0x44c   : > { %2137 = dma.done.wait (%p1738_p11), %s1276_s30, 1024  }
 0x44d   : > { %2139 = vsyncadd (%p1738_p11), %s1276_s30, 4294966272  ;;  %s27_s19 = sadd.s32 1, %s2182_s19   ;;  %s2719_s4 = sld [smem:[#allocation29_spill]] }
 0x44e   : > { %p24_p10 = scmp.ge.s32.totalorder %s27_s19, 8   ;;  %s2720_s9 = sld [smem:[#allocation26_spill]] }
 0x44f   : > { %s2721_s5 = sld [smem:[#allocation27_spill]]  ;;  %s2722_s30 = smov %s2146_s10 }
 0x450   : > { %s2723_s10 = smov %s2150_s11  ;;  %s2724_s11 = smov %s2446_s27 }
 0x451   : > { %s2725_s12 = smov %s2158_s13  ;;  %s2726_s13 = smov %s2162_s14 }
 0x452   : > { %s2728_s15 = smov %s2174_s17  ;;  %s2729_s16 = smov %s2178_s18 }
 0x453   : > { %s2727_s14 = smov %s2719_s4  ;;  %26 = sbr.rel (!%p24_p10) target bundleno = 18 (0x12), region = 149 }
 0x454   : > { %s2730_s17 = smov %s2720_s9 }
 0x455   : > { %s2731_s18 = smov %s2721_s5 }
 0x458   :  { %1281 = vsyncpa [#allocation5], 1 }
 0x459   :  { %1283 = vsyncpa [#allocation5 + $0x1], 1 }
 0x45a   :  { %1284 = vsyncpa [#allocation8], 1 }
 0x45b   :  { %1285 = vsyncpa [#allocation12], 1 }
 0x45c   :  { %1286 = vsyncpa [#allocation6], 1 }
 0x45d   :  { %1288 = vsyncpa [#allocation6 + $0x1], 1 }

</bundles_post_ra>
